<compile_context>
chip_gen: v7x
topology: tpu7x:2x2x1
jax: 0.10.0
libtpu: 0.0.40
codegen_flags: <defaults>
</compile_context>

<pallas_src>
import functools
import math

import jax
import jax.numpy as jnp
from jax.experimental import pallas as pl
from jax.experimental.pallas import tpu as pltpu


def _eca_kernel_size(channels, b=1, gamma=2):
    k = int(abs(math.log2(channels) / gamma + b / gamma))
    return k if k % 2 else k + 1


def _round_up(n, m):
    return (n + m - 1) // m * m


def _vmem_capacity_bytes():
    try:
        cap = getattr(pltpu.get_tpu_info(), "vmem_capacity_bytes", None)
        if cap:
            return int(cap)
    except Exception:
        pass
    return 64 << 20  # conservative default (v7x-sized TensorCore)


def _budget(vmem_cap):
    """(target block bytes, scoped-vmem cap) for this TPU generation."""
    if vmem_cap <= (64 << 20):          # v7x-class TensorCore: 64 MiB VMEM
        return 4 << 20, 40 << 20
    return 8 << 20, 80 << 20            # v5e / v6e: 128 MiB VMEM


def _channel_conv(y, taps, pad):
    """Conv1d(1, 1, k, padding=pad, bias=False) along the channel axis of (B, C)."""
    C = y.shape[-1]
    ypad = jnp.pad(y, ((0, 0), (pad, pad)))
    conv = jnp.zeros_like(y)
    for j, w in enumerate(taps):
        conv = conv + w * ypad[:, j:j + C]
    return conv


# --------------------------------------------------------------------------- #
# Single-pass path: one (TB, C, HWp) block per grid step.
# --------------------------------------------------------------------------- #
def _eca_single_kernel(w_ref, x_ref, o_ref, *, k, pad, inv_hw):
    # w_ref: SMEM (k,) f32 conv taps;  x_ref / o_ref: VMEM (TB, C, HWp) blocks.
    # AdaptiveAvgPool2d(1): f32-accumulated sum over the spatial (lane) axis,
    # scaled by 1/HW (true spatial size; zero lane-padding contributes nothing).
    y = jnp.sum(x_ref[...], axis=-1, dtype=jnp.float32) * inv_hw       # (TB, C)
    conv = _channel_conv(y, [w_ref[j] for j in range(k)], pad)
    gate = jax.nn.sigmoid(conv).astype(o_ref.dtype)                     # (TB, C)
    # Gate multiply in the input dtype -> no full-block f32 upcast / extra pass.
    o_ref[...] = x_ref[...] * gate[:, :, None]


def _plan_single(B, C, HWp, itemsize, target_block, limit_cap):
    per_elem = C * HWp * itemsize

    def need(tb):
        blk = tb * per_elem
        # Double-buffered (in + out) pipeline + in-kernel temporaries
        # (native-dtype block value + f32 reduction copy) + margin.
        return 4 * blk + blk + tb * C * HWp * 4 + (2 << 20)

    tb = max(1, min(B, target_block // max(1, per_elem)))
    if B >= 2:
        tb = min(tb, max(1, B // 2))        # keep >= 2 grid steps (v7x megacore)
    while tb > 1 and (B % tb or need(tb) > limit_cap):
        tb -= 1
    if need(tb) > limit_cap:
        return None                          # even a 1-element block won't fit
    return tb, int(min(max(need(tb), 16 << 20), limit_cap))


# --------------------------------------------------------------------------- #
# Two-pass HW-tiled path (B == 1 with big maps, or VMEM-oversized blocks).
# --------------------------------------------------------------------------- #
def _eca_pool_kernel(x_ref, sum_ref, *, inv_hw):
    # x_ref: (TB, C, THW) block;  sum_ref: (TB, C, 1) f32 accumulator, resident
    # across the HW grid axis.
    h = pl.program_id(1)

    @pl.when(h == 0)
    def _():
        sum_ref[...] = jnp.zeros_like(sum_ref)

    sum_ref[...] += jnp.sum(x_ref[...], axis=-1, keepdims=True, dtype=jnp.float32)

    @pl.when(h == pl.num_programs(1) - 1)
    def _():
        sum_ref[...] = sum_ref[...] * inv_hw


def _eca_apply_kernel(g_ref, x_ref, o_ref):
    # g_ref: (TB, C, 1) gate in the input dtype;  x_ref / o_ref: (TB, C, THW).
    o_ref[...] = x_ref[...] * g_ref[...]


# --------------------------------------------------------------------------- #
# Wrapper
# --------------------------------------------------------------------------- #
def channel_attention(x, weight, *, force_two_pass=False, hw_chunk=None):
    """ECA forward: x (B, C, H, W), weight (k,) Conv1d(1,1,k,bias=False) taps."""
    B, C, H, W = x.shape
    k = int(weight.shape[0])
    pad = (k - 1) // 2
    HW = H * W
    inv_hw = 1.0 / float(HW)
    weight = weight.astype(jnp.float32)
    itemsize = jnp.dtype(x.dtype).itemsize

    vmem_cap = _vmem_capacity_bytes()
    target_block, limit_cap = _budget(vmem_cap)

    HWp1 = _round_up(HW, 128)                      # lane-dense single-pass width
    plan = None if force_two_pass else _plan_single(
        B, C, HWp1, itemsize, target_block, limit_cap)
    big_single_batch = (B == 1) and (C * HWp1 * itemsize > target_block)
    use_two_pass = force_two_pass or (plan is None) or big_single_batch

    xr = x.reshape(B, C, HW)

    if not use_two_pass:
        tb, vmem_limit = plan
        if HWp1 != HW:
            xr = jnp.pad(xr, ((0, 0), (0, 0), (0, HWp1 - HW)))
        cost = pl.CostEstimate(
            flops=2 * B * C * HWp1 + 2 * B * C * k,
            transcendentals=B * C,
            bytes_accessed=2 * B * C * HWp1 * itemsize + k * 4,
        )
        out = pl.pallas_call(
            functools.partial(_eca_single_kernel, k=k, pad=pad, inv_hw=inv_hw),
            out_shape=jax.ShapeDtypeStruct((B, C, HWp1), x.dtype),
            grid=(B // tb,),
            in_specs=[
                pl.BlockSpec(memory_space=pltpu.MemorySpace.SMEM),   # (k,) taps
                pl.BlockSpec((tb, C, HWp1), lambda b: (b, 0, 0)),
            ],
            out_specs=pl.BlockSpec((tb, C, HWp1), lambda b: (b, 0, 0)),
            compiler_params=pltpu.CompilerParams(
                dimension_semantics=("parallel",),
                vmem_limit_bytes=vmem_limit,
            ),
            cost_estimate=cost,
        )(weight, xr)
        if HWp1 != HW:
            out = out[:, :, :HW]
        return out.reshape(B, C, H, W)

    # ------------------------- two-pass HW-tiled path ------------------------ #
    tb = 1
    thw = int(hw_chunk) if hw_chunk is not None else target_block // max(1, C * itemsize)
    thw = max(128, (thw // 128) * 128)
    thw = min(thw, _round_up(HW, 128))
    grid_hw = pl.cdiv(HW, thw)
    HWp = grid_hw * thw
    if HWp != HW:
        xr = jnp.pad(xr, ((0, 0), (0, 0), (0, HWp - HW)))

    blk = tb * C * thw * itemsize
    pool_limit = int(min(max(3 * blk + tb * C * thw * 4 + (2 << 20), 16 << 20), limit_cap))
    apply_limit = int(min(max(5 * blk + (2 << 20), 16 << 20), limit_cap))

    # Pass 1: per-channel f32 means, accumulated across HW chunks.
    sums = pl.pallas_call(
        functools.partial(_eca_pool_kernel, inv_hw=inv_hw),
        out_shape=jax.ShapeDtypeStruct((B, C, 1), jnp.float32),
        grid=(B // tb, grid_hw),
        in_specs=[pl.BlockSpec((tb, C, thw), lambda b, h: (b, 0, h))],
        out_specs=pl.BlockSpec((tb, C, 1), lambda b, h: (b, 0, 0)),
        compiler_params=pltpu.CompilerParams(
            dimension_semantics=("parallel", "arbitrary"),
            vmem_limit_bytes=pool_limit,
        ),
        cost_estimate=pl.CostEstimate(
            flops=B * C * HWp,
            transcendentals=0,
            bytes_accessed=B * C * HWp * itemsize + B * C * 4,
        ),
    )(xr)

    # Tiny (B, C) channel conv + sigmoid: plain JAX between the two passes.
    y = sums[:, :, 0]                                               # (B, C) f32
    conv = _channel_conv(y, [weight[j] for j in range(k)], pad)
    gate = jax.nn.sigmoid(conv).astype(x.dtype)[:, :, None]         # (B, C, 1)

    # Pass 2: re-stream HW chunks applying the gate (fully parallel grid).
    out = pl.pallas_call(
        _eca_apply_kernel,
        out_shape=jax.ShapeDtypeStruct((B, C, HWp), x.dtype),
        grid=(B // tb, grid_hw),
        in_specs=[
            pl.BlockSpec((tb, C, 1), lambda b, h: (b, 0, 0)),
            pl.BlockSpec((tb, C, thw), lambda b, h: (b, 0, h)),
        ],
        out_specs=pl.BlockSpec((tb, C, thw), lambda b, h: (b, 0, h)),
        compiler_params=pltpu.CompilerParams(
            dimension_semantics=("parallel", "parallel"),
            vmem_limit_bytes=apply_limit,
        ),
        cost_estimate=pl.CostEstimate(
            flops=B * C * HWp,
            transcendentals=0,
            bytes_accessed=2 * B * C * HWp * itemsize + B * C * itemsize,
        ),
    )(gate, xr)
    if HWp != HW:
        out = out[:, :, :HW]
    return out.reshape(B, C, H, W)


def channel_attention_ref(x, weight):
    """Pure-JAX reference matching the PyTorch forward."""
    B, C, H, W = x.shape
    k = weight.shape[0]
    pad = (k - 1) // 2
    y = jnp.mean(x.astype(jnp.float32), axis=(2, 3))                 # (B, C)
    conv = _channel_conv(y, [weight[j] for j in range(k)], pad)
    s = jax.nn.sigmoid(conv).astype(x.dtype)[:, :, None, None]
    return x * s


if __name__ == "__main__":
    key = jax.random.PRNGKey(0)
    kx, kw, kx2 = jax.random.split(key, 3)

    # Primary check: single-pass path, lane-aligned spatial (HW = 256).
    B, C, H, W = 2, 16, 16, 16           # C = 16 -> ECA kernel_size = 3
    k = _eca_kernel_size(C)
    bound = 1.0 / math.sqrt(1 * k)       # Conv1d(1,1,k,bias=False) init bound
    weight = jax.random.uniform(kw, (k,), dtype=jnp.float32,
                                minval=-bound, maxval=bound)
    x = jax.random.normal(kx, (B, C, H, W), dtype=jnp.float32)

    out = jax.block_until_ready(channel_attention(x, weight))
    ref = channel_attention_ref(x, weight)
    assert out.shape == x.shape and out.dtype == x.dtype
    assert jnp.allclose(out, ref, atol=1e-5, rtol=1e-5)

    # Secondary check: single-pass path with HW not a multiple of 128 (lane pad).
    x_odd = jax.random.normal(kx2, (2, 16, 7, 7), dtype=jnp.float32)
    out_odd = jax.block_until_ready(channel_attention(x_odd, weight))
    assert jnp.allclose(out_odd, channel_attention_ref(x_odd, weight),
                        atol=1e-5, rtol=1e-5)

    # Third check: force the two-pass HW-tiled path (multi-chunk accumulation
    # plus lane padding of a ragged HW).
    x_big = jax.random.normal(kx, (1, 16, 16, 20), dtype=jnp.float32)
    out_two = jax.block_until_ready(
        channel_attention(x_big, weight, force_two_pass=True, hw_chunk=128))
    assert jnp.allclose(out_two, channel_attention_ref(x_big, weight),
                        atol=1e-5, rtol=1e-5)

    print("KERNEL_OK")
</pallas_src>

<mosaic_0001>
module attributes {stable_mosaic.version = 11 : i64} {
  func.func @_eca_single_kernel(%arg0: i32, %arg1: memref<3xf32, #tpu.memory_space<smem>>, %arg2: memref<1x16x256xf32, #tpu.memory_space<vmem>>, %arg3: memref<1x16x256xf32, #tpu.memory_space<vmem>>) attributes {dimension_semantics = [#tpu.dimension_semantics<parallel>], iteration_bounds = array<i64: 2>, scalar_prefetch = 0 : i64, scratch_operands = 0 : i64, tpu.core_type = #tpu.core_type<tc>, window_params = [{transform_indices = @transform_0, window_bounds = array<i64: 3>}, {transform_indices = @transform_1, window_bounds = array<i64: 1, 16, 256>}, {transform_indices = @transform_2, window_bounds = array<i64: 1, 16, 256>}]} {
    %c0 = arith.constant 0 : index
    %c0_0 = arith.constant 0 : index
    %c0_1 = arith.constant 0 : index
    %0 = vector.load %arg2[%c0, %c0_0, %c0_1] : memref<1x16x256xf32, #tpu.memory_space<vmem>>, vector<1x16x256xf32>
    %cst = arith.constant dense<0.000000e+00> : vector<1x16xf32>
    %1 = vector.multi_reduction <add>, %0, %cst [2] : vector<1x16x256xf32> to vector<1x16xf32>
    %cst_2 = arith.constant 3.906250e-03 : f32
    %2 = vector.broadcast %cst_2 : f32 to vector<1x16xf32>
    %3 = arith.mulf %1, %2 : vector<1x16xf32>
    %c0_3 = arith.constant 0 : index
    %4 = memref.load %arg1[%c0_3] : memref<3xf32, #tpu.memory_space<smem>>
    %c1 = arith.constant 1 : index
    %5 = memref.load %arg1[%c1] : memref<3xf32, #tpu.memory_space<smem>>
    %c2 = arith.constant 2 : index
    %6 = memref.load %arg1[%c2] : memref<3xf32, #tpu.memory_space<smem>>
    %c0_i32 = arith.constant 0 : i32
    %7 = arith.sitofp %c0_i32 : i32 to f32
    %8 = vector.broadcast %7 : f32 to vector<1x1xf32>
    %9 = tpu.concatenate %8, %3 in 1 : vector<1x1xf32>, vector<1x16xf32> -> vector<1x17xf32>
    %10 = vector.broadcast %7 : f32 to vector<1x1xf32>
    %11 = tpu.concatenate %9, %10 in 1 : vector<1x17xf32>, vector<1x1xf32> -> vector<1x18xf32>
    %cst_4 = arith.constant 0.000000e+00 : f32
    %12 = vector.broadcast %cst_4 : f32 to vector<1x16xf32>
    %13 = vector.extract_strided_slice %11 {offsets = [0, 0], sizes = [1, 16], strides = [1, 1]} : vector<1x18xf32> to vector<1x16xf32>
    %14 = vector.broadcast %4 : f32 to vector<1x16xf32>
    %15 = arith.mulf %14, %13 : vector<1x16xf32>
    %16 = arith.addf %12, %15 : vector<1x16xf32>
    %17 = vector.extract_strided_slice %11 {offsets = [0, 1], sizes = [1, 16], strides = [1, 1]} : vector<1x18xf32> to vector<1x16xf32>
    %18 = vector.broadcast %5 : f32 to vector<1x16xf32>
    %19 = arith.mulf %18, %17 : vector<1x16xf32>
    %20 = arith.addf %16, %19 : vector<1x16xf32>
    %21 = vector.extract_strided_slice %11 {offsets = [0, 2], sizes = [1, 16], strides = [1, 1]} : vector<1x18xf32> to vector<1x16xf32>
    %22 = vector.broadcast %6 : f32 to vector<1x16xf32>
    %23 = arith.mulf %22, %21 : vector<1x16xf32>
    %24 = arith.addf %20, %23 : vector<1x16xf32>
    %25 = arith.negf %24 : vector<1x16xf32>
    %26 = math.exp %25 : vector<1x16xf32>
    %cst_5 = arith.constant 1.000000e+00 : f32
    %27 = vector.broadcast %cst_5 : f32 to vector<1x16xf32>
    %28 = arith.addf %27, %26 : vector<1x16xf32>
    %29 = arith.divf %27, %28 : vector<1x16xf32>
    %c0_6 = arith.constant 0 : index
    %c0_7 = arith.constant 0 : index
    %c0_8 = arith.constant 0 : index
    %30 = vector.load %arg2[%c0_6, %c0_7, %c0_8] : memref<1x16x256xf32, #tpu.memory_space<vmem>>, vector<1x16x256xf32>
    %31 = vector.shape_cast %29 : vector<1x16xf32> to vector<1x16x1xf32>
    %32 = vector.broadcast %31 : vector<1x16x1xf32> to vector<1x16x256xf32>
    %33 = arith.mulf %30, %32 : vector<1x16x256xf32>
    %c0_9 = arith.constant 0 : index
    %c0_10 = arith.constant 0 : index
    %c0_11 = arith.constant 0 : index
    %34 = vector.load %arg3[%c0_9, %c0_10, %c0_11] : memref<1x16x256xf32, #tpu.memory_space<vmem>>, vector<1x16x256xf32>
    tpu.vector_store %arg3[%c0_9, %c0_10, %c0_11], %33 {strides = array<i32>} : memref<1x16x256xf32, #tpu.memory_space<vmem>>, vector<1x16x256xf32>,
    return
  }
  func.func @transform_0(%arg0: i32) -> i32 {
    %c0_i32 = arith.constant 0 : i32
    %c0_i32_0 = arith.constant 0 : i32
    return %c0_i32 : i32
  }
  func.func @transform_1(%arg0: i32) -> (i32, i32, i32) {
    %c0_i32 = arith.constant 0 : i32
    %c0_i32_0 = arith.constant 0 : i32
    %c0_i32_1 = arith.constant 0 : i32
    return %arg0, %c0_i32, %c0_i32_0 : i32, i32, i32
  }
  func.func @transform_2(%arg0: i32) -> (i32, i32, i32) {
    %c0_i32 = arith.constant 0 : i32
    %c0_i32_0 = arith.constant 0 : i32
    %c0_i32_1 = arith.constant 0 : i32
    return %arg0, %c0_i32, %c0_i32_0 : i32, i32, i32
  }
}

</mosaic_0001>

<bundles_post_ra>
// kernel: tpu_custom_call.1
= control target key start
LH: loop header
LB: loop body
LE: loop exit
PB: predicated region body
PF: predicated region fallthrough
CT: control target
= control target key end

     0   :  { %7 = vsyncpa [#allocation5], 0  ;;  %s780_s0 = inlined_call_operand.hbm [shape: f32[3], index: 0, kind: input, shape index: {}]   ;;  %s781_s1 = inlined_call_operand.hbm [shape: f32[2,16,256], index: 1, kind: input, shape index: {}]   ;;  %s782_s2 = inlined_call_operand.hbm [shape: f32[2,16,256], index: 2, kind: output, shape index: {}]  }
   0x1   :  { %8 = vsyncpa [#allocation3], 0 }
   0x2   :  { %10 = vsyncpa [#allocation3 + $0x1], 0 }
   0x3   :  { %11 = vsyncpa [#allocation4], 0 }
   0x4   :  { %13 = vsyncpa [#allocation4 + $0x1], 0  ;;  %s578_s9 = smov 0   ;;  %s580_s10 = smov 0  }
   0x5   :  { %s582_s11 = smov 0   ;;  %s584_s12 = smov 0  }
   0x6 LB: > { %s599_s13 = sadd.s32 4294967295, %s552_s12   ;;  %s351_s14 = sadd.s32 4294967294, %s552_s12   ;;  %s552_s12 = sphi %s584_s12, %s802_s12   ;;  %s548_s11 = sphi %s582_s11, %s801_s11   ;;  %s544_s10 = sphi %s580_s10, %s800_s10   ;;  %s540_s9 = sphi %s578_s9, %s799_s9  }
   0x7   : > { %s603_s15 = sadd.s32 1, %s552_s12   ;;  %s47_s16 = sadd.s32 1, %s548_s11 }
   0x8   : > { %s44_s17 = ssub.s32 %s552_s12, %s603_s15  ;;  %p54_p0 = scmp.ne.s32.totalorder %s548_s11, %s544_s10 }
   0x9   : > { %p45_p1 = scmp.eq.s32.totalorder %s44_s17, 0  ;;  %p55_p2 = scmp.eq.s32.totalorder %s552_s12, 0 }
   0xa   : > { %p60_p3 = scmp.ne.s32.totalorder %s544_s10, %s540_s9  ;;  %p783_p4 = scmp.eq.s32.totalorder %s599_s13, 0 }
   0xb   : > { %s615_s18 = scalar_select %p45_p1, %s548_s11, %s47_s16  }
   0xc   : > { %p617_p5 = por %p55_p2, %p54_p0  ;;  %p623_p6 = por %p783_p4, %p60_p3 }
   0xd   : > { %p84_p7 = scmp.eq.s32.totalorder %s599_s13, 1  ;;  %p90_p8 = scmp.eq.s32.totalorder %s351_s14, 1 }
   0xe   : > { %s787_s20 = scalar_select %p623_p6, 1, 0 }
   0xf   : > { %p352_p9 = scmp.ge.s32.totalorder %s552_s12, 1  ;;  %p97_p10 = scmp.lt.s32.totalorder %s552_s12, 3 }
  0x10   : > { %p630_p11 = por %p84_p7, %p54_p0  ;;  %p634_p12 = por %p90_p8, %p60_p3 }
  0x11   : > { %p638_p13 = pnand %p352_p9, %p97_p10  ;;  %p393_p4 = scmp.lt.s32.totalorder %s552_s12, 2 }
  0x12   : > { %s788_s21 = scalar_select %p630_p11, 1, 0 }
  0x13   : > { %s789_s22 = scalar_select %p634_p12, 1, 0 }
  0x14   : > { %p380_p2 = pneg %p638_p13  ;;  %s119_s24 = sand.u32 1, %s548_s11  }
  0x15   : > { %s370_s25 = sshll.u32 %s552_s12, 9  ;;  %p791_p6 = scmp.eq.s32.totalorder %s599_s13, 0 }
  0x16   : > { %p652_p7 = pnand %p393_p4, %p617_p5  ;;  %s355_s27 = sshll.u32 %s119_s24, 5 }
  0x17   : > { %p381_p0 = pnand %p380_p2, %p791_p6  ;;  %s439_s30 = scalar_lea.hbm %s780_s0, 16 }
  0x18   : > { %p440_p3 = scmp.ne.s32.totalorder %s780_s0, %s439_s30  ;;  %p446_p6 = scmp.lt.u32.totalorder %s439_s30, %s780_s0 }
  0x19   : > { %p441_p8 = pneg %p381_p0 }
  0x1b   : > { %p442_p9 = pnand %p441_p8, %p440_p3 }
  0x1d   : > { %p443_p10 = pneg %p442_p9 }
  0x1f   : > { %p448_p4 = pnand %p446_p6, %p443_p10 }
  0x21   : > { %451 = shalt.err (!%p448_p4)
}
  0x22   : > { %s554_s7 = smov [#allocation2]   ;;  %s671_s19 = scalar_lea.hbm %s781_s1, %s370_s25 }
  0x23   : > { %383 = dma.hbm_to_smem (!%p381_p0), %s780_s0, 16, %s554_s7, [#allocation5]  }
  0x24   : > { %s123_s28 = scalar_lea.vmem [#allocation6], %s355_s27  ;;  %s675_s30 = scalar_lea.sflag [#allocation3], %s119_s24 }
  0x25   : > { %s130_s29 = sshll.u32 %s123_s28, 4  ;;  %s452_s3 = scalar_lea.hbm %s671_s19, 512  ;;  %s673_s29 = int_to_ptr.vmem [resolvable:$true] %s130_s29 }
  0x26   : > { %p453_p5 = scmp.ne.s32.totalorder %s671_s19, %s452_s3  ;;  %p454_p2 = pneg %p652_p7 }
  0x27   : > { %s457_s5 = scalar_lea.hbm %s781_s1, 1024  ;;  %p458_p8 = scmp.lt.u32.totalorder %s671_s19, %s781_s1 }
  0x28   : > { %p455_p0 = pnand %p454_p2, %p453_p5  ;;  %p459_p9 = scmp.lt.u32.totalorder %s457_s5, %s452_s3 }
  0x29   : > { %p461_p6 = scmp.lt.u32.totalorder %s452_s3, %s671_s19 }
  0x2a   : > { %p456_p3 = pneg %p455_p0  ;;  %p460_p10 = por %p459_p9, %p458_p8 }
  0x2c   : > { %p462_p4 = por %p461_p6, %p460_p10 }
  0x2e   : > { %p463_p1 = pnand %p462_p4, %p456_p3 }
  0x30   : > { %466 = shalt.err (!%p463_p1)
}
  0x31   : > { %s467_s24 = scalar_lea.vmem %s673_s29, 512  ;;  %s555_s27 = smov [#allocation6]  }
  0x32   : > { %p468_p5 = scmp.ne.s32.totalorder %s673_s29, %s467_s24  ;;  %s472_s8 = sshll.u32 %s555_s27, 4  ;;  %s473_s8 = int_to_ptr.vmem [resolvable:$false] %s472_s8 }
  0x33   : > { %s474_s14 = scalar_lea.vmem %s473_s8, 1024  ;;  %p475_p11 = scmp.lt.s32.totalorder %s673_s29, %s473_s8 }
  0x34   : > { %p470_p0 = pnand %p468_p5, %p454_p2  ;;  %p476_p8 = scmp.lt.s32.totalorder %s474_s14, %s467_s24 }
  0x36   : > { %p471_p12 = pneg %p470_p0  ;;  %p477_p9 = por %p476_p8, %p475_p11 }
  0x38   : > { %p478_p10 = pnand %p477_p9, %p471_p12 }
  0x3a   : > { %481 = shalt.err (!%p478_p10)
}
  0x3b   : > { %s556_s16 = smov 256   ;;  %s557_s17 = smov 16  }
  0x3c   : > { %387 = dma.hbm_to_vmem [thread:$0]  (!%p652_p7), %s671_s19, 512, %s673_s29, %s675_s30, %s556_s16, %s556_s16, %s557_s17  }
  0x3d   : > { %142 = sbr.rel (%p638_p13) target bundleno = 515 (0x203), region = 28  ;;  %p793_p1 = scmp.eq.s32.totalorder (!%p638_p13), %s599_s13, 0 }
  0x44   : > { %527 = dma.done.wait (%p793_p1), [#allocation5], 16   ;;  %p794_p2 = pmov %p793_p1 }
  0x45   : > { %s710_s28 = sand.u32 1, %s544_s10   ;;  %p795_p11 = scmp.ne.s32.totalorder %s787_s20, 0 }
  0x46   : > { %529 = vsyncadd (%p794_p2), [#allocation5], 4294967280  ;;  %s360_s3 = sshll.u32 %s710_s28, 5  ;;  %s149_s25 = scalar_lea.sflag [#allocation3], %s710_s28 }
  0x47   : > { %s152_s26 = scalar_lea.vmem [#allocation6], %s360_s3 }
  0x48   : > { %531 = dma.done.wait (%p795_p11), %s149_s25, 512  }
  0x49   : > { %533 = vsyncadd (%p795_p11), %s149_s25, 4294966784 }
  0x4a   : > { %157 = sfence }
  0x4b   : > { %v720_v0 = vld [vmem:[%s152_s26] sm:$0xff]  ;;  %v722_v1 = vld [vmem:[%s152_s26 + $0x8] sm:$0xff]  ;;  %v176_v2 = vld [vmem:[%s152_s26 + $0x10] sm:$0xff]  ;;  %v191_v6 = vlaneseq  ;;  %s362_s20 = sld [smem:[#allocation2 + $0x1]]  ;;  %s363_s23 = sld [smem:[#allocation2 + $0x2]]  ;;  %vm203_vm0 = vcmask 138312  }
  0x4c   : > { %v178_v3 = vadd.f32 %v722_v1, %v720_v0  ;;  %v177_v4 = vld [vmem:[%s152_s26 + $0x18] sm:$0xff]  ;;  %vm206_vm1 = vcmask 7168   ;;  %vm208_vm2 = vcmask 138240   ;;  %s558_s19 = smov 127   ;;  %s559_s29 = smov 126  }
  0x4d   : > { %v181_v5 = vadd.f32 %v177_v4, %v176_v2  ;;  %v192_v7 = vand.u32 127, %v191_v6  ;;  %v195_v9 = vshrl.u32 %v191_v6, 7  ;;  %s186_s30 = sld [smem:[#allocation2]]  ;;  %s173_s4 = scalar_lea.vmem [#allocation7], %s360_s3 }
  0x4e   : > { %179 = vadd.xlane.f32.xlu0 %v178_v3  ;;  %s266_s5 = sshll.u32 %s173_s4, 4  ;;  %s371_s6 = sshll.u32 %s599_s13, 9  ;;  %s729_s5 = int_to_ptr.vmem [resolvable:$true] %s266_s5 }
  0x4f   : > { %v193_v8 = vadd.s32 4294967295, %v192_v7  ;;  %v198_v10 = vadd.s32 4294967287, %v192_v7  ;;  %v235_v35 = vsub.s32 0, %v195_v9  ;;  %s734_s27 = scalar_lea.hbm %s782_s2, %s371_s6  ;;  %s253_s13 = scalar_lea.sflag [#allocation4], %s710_s28 }
  0x50   : > { %s482_s8 = scalar_lea.vmem %s729_s5, 512  ;;  %p796_p13 = scmp.ne.s32.totalorder %s788_s21, 0 }
  0x51   : > { %v196_v12 = vsub.s32 %v193_v8, %v195_v9  ;;  %v201_v14 = vsub.s32 %v198_v10, %v195_v9  ;;  %v213_v20 = vstv %s362_s20  ;;  %v220_v24 = vstv %s363_s23  ;;  %p483_p12 = scmp.ne.s32.totalorder %s729_s5, %s482_s8  ;;  %s560_s14 = smov [#allocation7]  }
  0x52   : > { %182 = vadd.xlane.f32.xlu0 %v181_v5  ;;  %s486_s16 = sshll.u32 %s560_s14, 4  ;;  %s487_s16 = int_to_ptr.vmem [resolvable:$false] %s486_s16 }
  0x53   : > { %v210_v26 = vstv %s186_s30  ;;  %p484_p7 = pnand %p483_p12, %p796_p13  ;;  %s488_s17 = scalar_lea.vmem %s487_s16, 1024 }
  0x54   : > { %p489_p6 = scmp.lt.s32.totalorder %s729_s5, %s487_s16  ;;  %p490_p4 = scmp.lt.s32.totalorder %s488_s17, %s482_s8 }
  0x55   : > { %p485_p3 = pneg %p484_p7 }
  0x56   : > { %p491_p5 = por %p490_p4, %p489_p6 }
  0x58   : > { %p492_p0 = pnand %p491_p5, %p485_p3 }
  0xdb   : > { %v180_v11 = vpop.xlane.xlu0 %179 }
  0xdc   : > { %v184_v13 = vmul.f32 0.00390625, %v180_v11 }
  0xde   : > { %v197_v17 = vrot.slane %v184_v13, %v196_v12 }
  0xdf   : > { %v183_v15 = vpop.xlane.xlu0 %182 }
  0xe0   : > { %v185_v16 = vmul.f32 0.00390625, %v183_v15 }
  0xe2   : > { %v202_v18 = vrot.slane %v185_v16, %v201_v14 }
  0xe4   : > { %v204_v19 = vsel %vm203_vm0, %v202_v18, %v197_v17 }
  0xe5   : > { %v207_v21 = vsel %vm206_vm1, 0.0, %v204_v19 }
  0xe6   : > { %v209_v22 = vsel %vm208_vm2, %v207_v21, 0.0 }
  0xe7   : > { %v214_v23 = vmul.f32 %v213_v20, %v209_v22  ;;  %v221_v25 = vmul.f32 %v220_v24, %v209_v22  ;;  %v211_v28 = vmul.f32 %v210_v26, %v209_v22 }
  0xe9   : > { %216 = vrot.lane.b32.xlu1 %v214_v23, %s558_s19 }
  0xed   : > { %223 = vrot.lane.b32.xlu1 %v221_v25, %s559_s29 }
 0x15b   : > { %v217_v27 = vpop.permute.xlu1 %216 }
 0x15c   : > { %v219_v29 = vadd.f32 %v217_v27, %v211_v28 }
 0x15f   : > { %v224_v30 = vpop.permute.xlu1 %223 }
 0x160   : > { %v226_v31 = vadd.f32 %v224_v30, %v219_v29 }
 0x162   : > { %v364_v32 = vmul.f32 -1.442695, %v226_v31 }
 0x164   : > { %435 = vpow2.f32 %v364_v32 }
 0x16e   : > { %v436_v33 = vpop.eup %435 }
 0x16f   : > { %v230_v34 = vadd.f32 1.0, %v436_v33 }
 0x171   : > { %437 = vrcp.f32 %v230_v34 }
 0x17b   : > { %v438_v36 = vpop.eup %437 }
 0x17c   : > { %v236_v37 = vrot.slane %v438_v36, %v235_v35 }
 0x17e   : > { %242 = vbcast.lane.b32.xlu1 %v236_v37, 264  ;;  %238 = vbcast.lane.b32.xlu0 %v236_v37, 256 }
 0x1f0   : > { %v243_v38 = vpop.permute.xlu1 %242  ;;  %v239_v39 = vpop.permute.xlu0 %238 }
 0x1f1   : > { %v246_v40 = vmul.f32 %v243_v38, %v176_v2  ;;  %v247_v41 = vmul.f32 %v243_v38, %v177_v4  ;;  %v244_v42 = vmul.f32 %v239_v39, %v720_v0  ;;  %v245_v43 = vmul.f32 %v239_v39, %v722_v1 }
 0x1f3   : > { %250 = vst [vmem:[%s173_s4 + $0x10] sm:$0xff] %v246_v40  ;;  %251 = vst [vmem:[%s173_s4 + $0x18] sm:$0xff] %v247_v41 }
 0x1f4   : > { %248 = vst [vmem:[%s173_s4] sm:$0xff] %v244_v42  ;;  %249 = vst [vmem:[%s173_s4 + $0x8] sm:$0xff] %v245_v43 }
 0x1f5   : > { %495 = shalt.err (!%p492_p0)
}
 0x1f6   : > { %s496_s3 = scalar_lea.hbm %s734_s27, 512  ;;  %s500_s20 = scalar_lea.hbm %s782_s2, 1024 }
 0x1f7   : > { %p497_p8 = scmp.ne.s32.totalorder %s734_s27, %s496_s3  ;;  %p501_p1 = scmp.lt.u32.totalorder %s734_s27, %s782_s2 }
 0x1f8   : > { %p502_p2 = scmp.lt.u32.totalorder %s500_s20, %s496_s3  ;;  %p504_p12 = scmp.lt.u32.totalorder %s496_s3, %s734_s27 }
 0x1f9   : > { %p498_p9 = pnand %p497_p8, %p796_p13 }
 0x1fa   : > { %p503_p11 = por %p502_p2, %p501_p1 }
 0x1fb   : > { %p499_p10 = pneg %p498_p9 }
 0x1fc   : > { %p505_p7 = por %p504_p12, %p503_p11 }
 0x1fe   : > { %p506_p3 = pnand %p505_p7, %p499_p10 }
 0x200   : > { %509 = shalt.err (!%p506_p3)
}
 0x201   : > { %s561_s29 = smov 256   ;;  %s562_s30 = smov 16  }
 0x202   : > { %378 = dma.vmem_to_hbm [thread:$0]  (%p796_p13), %s729_s5, 512, %s734_s27, %s253_s13, %s561_s29, %s561_s29, %s562_s30  }
 0x203 PF: > { %s281_s4 = sand.u32 1, %s540_s9   ;;  %p797_p6 = scmp.ne.s32.totalorder %s789_s22, 0 }
 0x204   : > { %p798_p4 = scmp.ge.s32.totalorder %s552_s12, 2  ;;  %s282_s6 = scalar_lea.sflag [#allocation4], %s281_s4 }
 0x206   : > { %p389_p5 = pnand %p798_p4, %p797_p6 }
 0x208   : > { %535 = dma.done.wait (!%p389_p5), %s282_s6, 512  }
 0x209   : > { %537 = vsyncadd (!%p389_p5), %s282_s6, 4294966784  ;;  %p16_p0 = scmp.ge.s32.totalorder %s603_s15, 4   ;;  %s799_s9 = smov %s544_s10 }
 0x20a   : > { %s800_s10 = smov %s548_s11  ;;  %s801_s11 = smov %s615_s18 }
 0x20b   : > { %s802_s12 = smov %s603_s15  ;;  %18 = sbr.rel (!%p16_p0) target bundleno = 6 (0x6), region = 78 }
 0x212   :  { %287 = vsyncpa [#allocation3], 1 }
 0x213   :  { %289 = vsyncpa [#allocation3 + $0x1], 1 }
 0x214   :  { %290 = vsyncpa [#allocation4], 1 }
 0x215   :  { %292 = vsyncpa [#allocation4 + $0x1], 1 }
 0x216   :  { %293 = vsyncpa [#allocation5], 1 }
 0x217   :  { %295 = vsyncpa [#allocation5 + $0x1], 1 }

</bundles_post_ra>
